<compile_context>
chip_gen: v5e
topology: v5e:2x2
jax: 0.10.0
libtpu: 0.0.40
codegen_flags: <defaults>
</compile_context>

<pallas_src>
import jax
import jax.numpy as jnp
from jax.experimental import pallas as pl
from jax.experimental.pallas import tpu as pltpu


def _round_up(x, m):
    return ((x + m - 1) // m) * m


def _make_mlp_critic_kernel(num_hidden):
    """Build a kernel for `num_hidden` tanh hidden layers + a scalar head."""

    def kernel(*refs):
        obs_ref = refs[0]                  # [bb, obs_dim]  natural layout
        out_ref = refs[-1]                 # [1, bb]        batch on lanes
        wb = refs[1:-1]                    # w1,b1, w2,b2, ..., w_out,b_out

        x = obs_ref[...]                   # f32 [bb, obs_dim]

        # Layer 1: h^T = tanh(W1 @ x^T + b1) -> [h1, bb].
        # 'oi,bi->ob' contracts the last dims of both operands (same dot_general
        # form as flash-attention's q@k^T), so obs needs no HBM-side transpose
        # and batch lands directly on the lane axis.
        h = jnp.einsum("oi,bi->ob", wb[0][...], x,
                       preferred_element_type=jnp.float32)
        h = jnp.tanh(h + wb[1][...])

        # Remaining hidden layers: canonical MXU matmul, stays transposed.
        for l in range(1, num_hidden):
            w = wb[2 * l][...]             # [h_out, h_in]
            b = wb[2 * l + 1][...]         # [h_out, 1]
            h = jnp.dot(w, h, preferred_element_type=jnp.float32)
            h = jnp.tanh(h + b)
        # TODO(synk): if this becomes EUP(tanh)-bound on v6e at large tiles, a
        # VPU rational tanh approximation is the remaining compute lever.

        # Value head (h_last -> 1): VPU multiply + sublane reduce; avoids an MXU
        # matmul with a degenerate output width.  Result is [1, bb] lane-dense.
        w_out = wb[-2][...]                # [h_last, 1]
        b_out = wb[-1][...]                # [1, 1]
        v = jnp.sum(h * w_out, axis=0, keepdims=True) + b_out
        out_ref[...] = v.astype(out_ref.dtype)

    return kernel


def mlp_critic_forward(obs, params, *, batch_block=512, vmem_limit_bytes=None):
    """obs: [B, obs_dim].  params: list of (w, b) in PyTorch nn.Linear layout
    (w: [out, in], b: [out]); the last pair is the value head (out == 1).

    Returns value estimates of shape [B] (== torch.squeeze(v_net(obs), -1)).
    """
    if obs.dtype != jnp.float32:
        obs = obs.astype(jnp.float32)
    B, obs_dim = obs.shape

    layers = list(params)
    num_hidden = len(layers) - 1
    if num_hidden < 1:
        raise ValueError("MLPCritic kernel expects at least one hidden layer")
    if layers[-1][0].shape[0] != 1:
        raise ValueError("value head must have a single output feature")

    # Large, 128-aligned batch tile; only batch padding, no obs transpose pass.
    bb = max(128, min(_round_up(batch_block, 128), _round_up(B, 128)))
    b_pad = _round_up(B, bb)
    if b_pad != B:
        obs = jnp.pad(obs, ((0, b_pad - B), (0, 0)))
    grid = (b_pad // bb,)

    full = lambda i: (0, 0)   # tiny weights: fully resident, never re-fetched

    in_specs = [pl.BlockSpec((bb, obs_dim), lambda i: (i, 0))]
    flat_args = [obs]
    for li, (w, b) in enumerate(layers):
        out_d, in_d = w.shape
        w_arr = jnp.asarray(w, jnp.float32)
        b_arr = jnp.asarray(b, jnp.float32).reshape(out_d, 1)
        if li == num_hidden:               # head: column layout for VPU reduce
            w_arr = w_arr.reshape(in_d, 1)
        flat_args += [w_arr, b_arr]
        in_specs += [pl.BlockSpec(w_arr.shape, full),
                     pl.BlockSpec(b_arr.shape, full)]

    compiler_kwargs = dict(dimension_semantics=("parallel",))
    if vmem_limit_bytes is not None:
        # v7x has only 64 MiB physical VMEM; allow an explicit budget.
        compiler_kwargs["vmem_limit_bytes"] = vmem_limit_bytes

    out = pl.pallas_call(
        _make_mlp_critic_kernel(num_hidden),
        out_shape=jax.ShapeDtypeStruct((1, b_pad), jnp.float32),
        grid_spec=pltpu.PrefetchScalarGridSpec(
            num_scalar_prefetch=0,
            grid=grid,
            in_specs=in_specs,
            out_specs=pl.BlockSpec((1, bb), lambda i: (0, i)),
        ),
        compiler_params=pltpu.CompilerParams(**compiler_kwargs),
    )(*flat_args)

    return out[0, :B]


def init_params(key, obs_dim, hidden_sizes):
    """Deterministic synthetic init in PyTorch nn.Linear layout ([out, in])."""
    sizes = [obs_dim] + list(hidden_sizes) + [1]
    keys = jax.random.split(key, len(sizes) - 1)
    params = []
    for j in range(len(sizes) - 1):
        fan_in, fan_out = sizes[j], sizes[j + 1]
        wk, bk = jax.random.split(keys[j])
        bound = 1.0 / jnp.sqrt(fan_in)
        w = jax.random.uniform(wk, (fan_out, fan_in), jnp.float32, -bound, bound)
        b = jax.random.uniform(bk, (fan_out,), jnp.float32, -bound, bound)
        params.append((w, b))
    return params


def reference_forward(obs, params):
    """Plain-JAX reference of the same MLPCritic forward."""
    h = obs.astype(jnp.float32)
    for j, (w, b) in enumerate(params):
        h = h @ w.T + b
        if j < len(params) - 1:
            h = jnp.tanh(h)
    return jnp.squeeze(h, -1)


if __name__ == "__main__":
    key = jax.random.PRNGKey(0)
    k_obs, k_obs2, k_params = jax.random.split(key, 3)

    obs_dim = 16
    hidden_sizes = (32, 32)   # activation = nn.Tanh
    params = init_params(k_params, obs_dim, hidden_sizes)

    # Small batch: padded to one 128-wide lane tile, grid=(1,).
    obs_small = jax.random.normal(k_obs, (16, obs_dim), jnp.float32)
    v_small = jax.block_until_ready(mlp_critic_forward(obs_small, params))
    ref_small = reference_forward(obs_small, params)
    assert v_small.shape == (16,)
    assert jnp.allclose(v_small, ref_small, atol=1e-5, rtol=1e-5), (
        f"small-batch mismatch: {jnp.max(jnp.abs(v_small - ref_small))}")

    # Non-multiple batch exercising padding and a multi-step parallel grid.
    obs_big = jax.random.normal(k_obs2, (384, obs_dim), jnp.float32)
    v_big = jax.block_until_ready(
        mlp_critic_forward(obs_big, params, batch_block=256))
    ref_big = reference_forward(obs_big, params)
    assert v_big.shape == (384,)
    assert jnp.allclose(v_big, ref_big, atol=1e-5, rtol=1e-5), (
        f"large-batch mismatch: {jnp.max(jnp.abs(v_big - ref_big))}")

    print("KERNEL_OK")
</pallas_src>

<mosaic_0001>
module attributes {stable_mosaic.version = 11 : i64} {
  func.func @kernel(%arg0: i32, %arg1: memref<128x16xf32, #tpu.memory_space<vmem>>, %arg2: memref<32x16xf32, #tpu.memory_space<vmem>>, %arg3: memref<32x1xf32, #tpu.memory_space<vmem>>, %arg4: memref<32x32xf32, #tpu.memory_space<vmem>>, %arg5: memref<32x1xf32, #tpu.memory_space<vmem>>, %arg6: memref<32x1xf32, #tpu.memory_space<vmem>>, %arg7: memref<1x1xf32, #tpu.memory_space<vmem>>, %arg8: memref<1x128xf32, #tpu.memory_space<vmem>>) attributes {dimension_semantics = [#tpu.dimension_semantics<parallel>], iteration_bounds = array<i64: 1>, scalar_prefetch = 0 : i64, scratch_operands = 0 : i64, tpu.core_type = #tpu.core_type<tc>, window_params = [{transform_indices = @transform_0, window_bounds = array<i64: 128, 16>}, {pipeline_mode = #tpu.pipeline_mode<synchronous>, transform_indices = @transform_1, window_bounds = array<i64: 32, 16>}, {pipeline_mode = #tpu.pipeline_mode<synchronous>, transform_indices = @transform_2, window_bounds = array<i64: 32, 1>}, {pipeline_mode = #tpu.pipeline_mode<synchronous>, transform_indices = @transform_3, window_bounds = array<i64: 32, 32>}, {pipeline_mode = #tpu.pipeline_mode<synchronous>, transform_indices = @transform_4, window_bounds = array<i64: 32, 1>}, {pipeline_mode = #tpu.pipeline_mode<synchronous>, transform_indices = @transform_5, window_bounds = array<i64: 32, 1>}, {pipeline_mode = #tpu.pipeline_mode<synchronous>, transform_indices = @transform_6, window_bounds = array<i64: 1, 1>}, {transform_indices = @transform_7, window_bounds = array<i64: 1, 128>}]} {
    %c0 = arith.constant 0 : index
    %c0_0 = arith.constant 0 : index
    %0 = vector.load %arg1[%c0, %c0_0] : memref<128x16xf32, #tpu.memory_space<vmem>>, vector<128x16xf32>
    %c0_1 = arith.constant 0 : index
    %c0_2 = arith.constant 0 : index
    %1 = vector.load %arg2[%c0_1, %c0_2] : memref<32x16xf32, #tpu.memory_space<vmem>>, vector<32x16xf32>
    "tpu.trace_start"() <{level = 10 : i32, message = "oi,bi->ob"}> : () -> ()
    %cst = arith.constant dense<0.000000e+00> : vector<32x128xf32>
    %2 = tpu.matmul %1, %0, %cst {dimension_numbers = #tpu.dot_dimension_numbers<[1], [1], [0], [0], [0, 0, 1, 0], [], []>} : vector<32x16xf32>, vector<128x16xf32>, vector<32x128xf32> -> vector<32x128xf32>
    "tpu.trace_stop"() : () -> ()
    %c0_3 = arith.constant 0 : index
    %c0_4 = arith.constant 0 : index
    %3 = vector.load %arg3[%c0_3, %c0_4] : memref<32x1xf32, #tpu.memory_space<vmem>>, vector<32x1xf32>
    %4 = vector.broadcast %3 : vector<32x1xf32> to vector<32x128xf32>
    %5 = arith.addf %2, %4 : vector<32x128xf32>
    %6 = math.tanh %5 : vector<32x128xf32>
    %c0_5 = arith.constant 0 : index
    %c0_6 = arith.constant 0 : index
    %7 = vector.load %arg4[%c0_5, %c0_6] : memref<32x32xf32, #tpu.memory_space<vmem>>, vector<32x32xf32>
    %c0_7 = arith.constant 0 : index
    %c0_8 = arith.constant 0 : index
    %8 = vector.load %arg5[%c0_7, %c0_8] : memref<32x1xf32, #tpu.memory_space<vmem>>, vector<32x1xf32>
    %cst_9 = arith.constant dense<0.000000e+00> : vector<32x128xf32>
    %9 = tpu.matmul %7, %6, %cst_9 {dimension_numbers = #tpu.dot_dimension_numbers<[1], [0], [0], [1], [0, 0, 1, 1], [], []>} : vector<32x32xf32>, vector<32x128xf32>, vector<32x128xf32> -> vector<32x128xf32>
    %10 = vector.broadcast %8 : vector<32x1xf32> to vector<32x128xf32>
    %11 = arith.addf %9, %10 : vector<32x128xf32>
    %12 = math.tanh %11 : vector<32x128xf32>
    %c0_10 = arith.constant 0 : index
    %c0_11 = arith.constant 0 : index
    %13 = vector.load %arg6[%c0_10, %c0_11] : memref<32x1xf32, #tpu.memory_space<vmem>>, vector<32x1xf32>
    %c0_12 = arith.constant 0 : index
    %c0_13 = arith.constant 0 : index
    %14 = vector.load %arg7[%c0_12, %c0_13] : memref<1x1xf32, #tpu.memory_space<vmem>>, vector<1x1xf32>
    %15 = vector.broadcast %13 : vector<32x1xf32> to vector<32x128xf32>
    %16 = arith.mulf %12, %15 : vector<32x128xf32>
    %cst_14 = arith.constant dense<0.000000e+00> : vector<128xf32>
    %17 = vector.multi_reduction <add>, %16, %cst_14 [0] : vector<32x128xf32> to vector<128xf32>
    %18 = vector.shape_cast %17 : vector<128xf32> to vector<1x128xf32>
    %19 = vector.broadcast %14 : vector<1x1xf32> to vector<1x128xf32>
    %20 = arith.addf %18, %19 : vector<1x128xf32>
    %c0_15 = arith.constant 0 : index
    %c0_16 = arith.constant 0 : index
    %21 = vector.load %arg8[%c0_15, %c0_16] : memref<1x128xf32, #tpu.memory_space<vmem>>, vector<1x128xf32>
    tpu.vector_store %arg8[%c0_15, %c0_16], %20 {strides = array<i32>} : memref<1x128xf32, #tpu.memory_space<vmem>>, vector<1x128xf32>,
    return
  }
  func.func @transform_0(%arg0: i32) -> (i32, i32) {
    %c0_i32 = arith.constant 0 : i32
    %c0_i32_0 = arith.constant 0 : i32
    return %arg0, %c0_i32 : i32, i32
  }
  func.func @transform_1(%arg0: i32) -> (i32, i32) {
    %c0_i32 = arith.constant 0 : i32
    %c0_i32_0 = arith.constant 0 : i32
    %c0_i32_1 = arith.constant 0 : i32
    return %c0_i32, %c0_i32_0 : i32, i32
  }
  func.func @transform_2(%arg0: i32) -> (i32, i32) {
    %c0_i32 = arith.constant 0 : i32
    %c0_i32_0 = arith.constant 0 : i32
    %c0_i32_1 = arith.constant 0 : i32
    return %c0_i32, %c0_i32_0 : i32, i32
  }
  func.func @transform_3(%arg0: i32) -> (i32, i32) {
    %c0_i32 = arith.constant 0 : i32
    %c0_i32_0 = arith.constant 0 : i32
    %c0_i32_1 = arith.constant 0 : i32
    return %c0_i32, %c0_i32_0 : i32, i32
  }
  func.func @transform_4(%arg0: i32) -> (i32, i32) {
    %c0_i32 = arith.constant 0 : i32
    %c0_i32_0 = arith.constant 0 : i32
    %c0_i32_1 = arith.constant 0 : i32
    return %c0_i32, %c0_i32_0 : i32, i32
  }
  func.func @transform_5(%arg0: i32) -> (i32, i32) {
    %c0_i32 = arith.constant 0 : i32
    %c0_i32_0 = arith.constant 0 : i32
    %c0_i32_1 = arith.constant 0 : i32
    return %c0_i32, %c0_i32_0 : i32, i32
  }
  func.func @transform_6(%arg0: i32) -> (i32, i32) {
    %c0_i32 = arith.constant 0 : i32
    %c0_i32_0 = arith.constant 0 : i32
    %c0_i32_1 = arith.constant 0 : i32
    return %c0_i32, %c0_i32_0 : i32, i32
  }
  func.func @transform_7(%arg0: i32) -> (i32, i32) {
    %c0_i32 = arith.constant 0 : i32
    %c0_i32_0 = arith.constant 0 : i32
    return %c0_i32, %arg0 : i32, i32
  }
}

</mosaic_0001>

<bundles_post_ra>
// kernel: tpu_custom_call.1
= control target key start
LH: loop header
LB: loop body
LE: loop exit
PB: predicated region body
PF: predicated region fallthrough
CT: control target
= control target key end

     0   :  { %s614_s0 = inlined_call_operand.vmem [shape: f32[128,16], index: 0, kind: input, shape index: {}]   ;;  %s615_s1 = inlined_call_operand.vmem [shape: f32[32,16], index: 1, kind: input, shape index: {}]   ;;  %s616_s2 = inlined_call_operand.vmem [shape: f32[32,1], index: 2, kind: input, shape index: {}]   ;;  %s617_s3 = inlined_call_operand.vmem [shape: f32[32,32], index: 3, kind: input, shape index: {}]   ;;  %s618_s4 = inlined_call_operand.vmem [shape: f32[32,1], index: 4, kind: input, shape index: {}]   ;;  %s619_s5 = inlined_call_operand.vmem [shape: f32[32,1], index: 5, kind: input, shape index: {}]   ;;  %s620_s6 = inlined_call_operand.<no memory space> [shape: f32[1,1], index: 6, kind: input, shape index: {}]   ;;  %s621_s7 = inlined_call_operand.hbm [shape: f32[1,128], index: 7, kind: output, shape index: {}]  }
   0x1   :  { %v12_v0 = vstv %s620_s6 }
   0x2   :  { %13 = vst [vmem:[#allocation2] sm:$0x1] %v12_v0 }
   0x3   :  { %v44_v1 = vld [vmem:[%s614_s0 + $0x78] sm:$0xff]  ;;  %vm73_vm0 = vcmask 130048   ;;  %v43_v2 = vld [vmem:[%s614_s0 + $0x70] sm:$0xff] }
   0x4   :  { %328 = vmatpush.xpose.msk.msra.mxu3 %vm73_vm0, %v44_v1  ;;  %327 = vmatpush.xpose.msk.msra.mxu2 %vm73_vm0, %v44_v1 }
   0x5   :  { %303 = vmatpush.xpose.msk.msra.mxu0 %vm73_vm0, %v44_v1 }
   0x6   :  { %14 = vsyncpa [#allocation4], 0  ;;  %v42_v3 = vld [vmem:[%s614_s0 + $0x68] sm:$0xff]  ;;  %v41_v4 = vld [vmem:[%s614_s0 + $0x60] sm:$0xff]  ;;  %v406_v8 = vmov 0   ;;  %vm195_vm1 = vcmask 261120  }
   0x7   :  { %v40_v5 = vld [vmem:[%s614_s0 + $0x58] sm:$0xff]  ;;  %v39_v7 = vld [vmem:[%s614_s0 + $0x50] sm:$0xff]  ;;  %361 = vset.pattern.permute.xlu0 %v406_v8  ;;  %362 = vset.pattern.permute.xlu1 %v406_v8  ;;  %v38_v9 = vld [vmem:[%s614_s0 + $0x48] sm:$0xff]  ;;  %s294_s23 = sshll.u32 %s621_s7, 4  ;;  %s295_s23 = int_to_ptr.hbm [resolvable:$true] %s294_s23 }
   0x8   :  { %330 = vmatpush.xpose.msk.msra.mxu3 %vm73_vm0, %v43_v2  ;;  %329 = vmatpush.xpose.msk.msra.mxu2 %vm73_vm0, %v43_v2  ;;  %v52_v6 = vld [vmem:[%s616_s2 + $0x18] sm:$0xff]  ;;  %v51_v10 = vld [vmem:[%s616_s2 + $0x10] sm:$0xff]  ;;  %v37_v11 = vld [vmem:[%s614_s0 + $0x40] sm:$0xff] }
   0x9   :  { %304 = vmatpush.xpose.msk.msra.mxu0 %vm73_vm0, %v43_v2  ;;  %70 = vperm.xlu0 %361, %v52_v6   ;;  %v50_v12 = vld [vmem:[%s616_s2 + $0x8] sm:$0xff]  ;;  %v36_v13 = vld [vmem:[%s614_s0 + $0x38] sm:$0xff]  ;;  %v173_v14 = vld [vmem:[%s618_s4 + $0x10] sm:$0xff] }
   0xa   :  { %363 = vset.pattern.permute.xlu2 %v406_v8  ;;  %60 = vperm.xlu1 %362, %v50_v12   ;;  %v35_v15 = vld [vmem:[%s614_s0 + $0x30] sm:$0xff]  ;;  %v49_v16 = vld [vmem:[%s616_s2] sm:$0xff]  ;;  %v34_v17 = vld [vmem:[%s614_s0 + $0x28] sm:$0xff] }
   0xb   :  { %v242_v18 = vld [vmem:[%s619_s5 + $0x8] sm:$0xff]  ;;  %v33_v19 = vld [vmem:[%s614_s0 + $0x20] sm:$0xff]  ;;  %v174_v20 = vld [vmem:[%s618_s4 + $0x18] sm:$0xff] }
   0xc   :  { %332 = vmatpush.xpose.msk.msra.mxu3 %vm73_vm0, %v42_v3  ;;  %331 = vmatpush.xpose.msk.msra.mxu2 %vm73_vm0, %v42_v3  ;;  %v32_v21 = vld [vmem:[%s614_s0 + $0x18] sm:$0xff]  ;;  %v245_v22 = vld [vmem:[#allocation2] sm:$0x1]  ;;  %v31_v23 = vld [vmem:[%s614_s0 + $0x10] sm:$0xff] }
   0xd   :  { %305 = vmatpush.xpose.msk.msra.mxu0 %vm73_vm0, %v42_v3  ;;  %v243_v24 = vld [vmem:[%s619_s5 + $0x10] sm:$0xff]  ;;  %v30_v25 = vld [vmem:[%s614_s0 + $0x8] sm:$0xff]  ;;  %v29_v26 = vld [vmem:[%s614_s0] sm:$0xff] }
   0xe   :  { %v47_v27 = vld [vmem:[%s615_s1 + $0x10] sm:$0xff]  ;;  %v46_v28 = vld [vmem:[%s615_s1 + $0x8] sm:$0xff]  ;;  %v45_v29 = vld [vmem:[%s615_s1] sm:$0xff] }
   0xf   :  { %v48_v30 = vld [vmem:[%s615_s1 + $0x18] sm:$0xff]  ;;  %v171_v39 = vld [vmem:[%s618_s4] sm:$0xff]  ;;  %v172_v45 = vld [vmem:[%s618_s4 + $0x8] sm:$0xff] }
  0x10   :  { %334 = vmatpush.xpose.msk.msra.mxu3 %vm73_vm0, %v41_v4  ;;  %333 = vmatpush.xpose.msk.msra.mxu2 %vm73_vm0, %v41_v4  ;;  %v167_v48 = vld [vmem:[%s617_s3] sm:$0xff]  ;;  %v168_v51 = vld [vmem:[%s617_s3 + $0x8] sm:$0xff]  ;;  %v244_v52 = vld [vmem:[%s619_s5 + $0x18] sm:$0xff] }
  0x11   :  { %306 = vmatpush.xpose.msk.msra.mxu0 %vm73_vm0, %v41_v4  ;;  %65 = vperm.xlu0 %361, %v51_v10   ;;  %v241_v50 = vld [vmem:[%s619_s5] sm:$0xff]  ;;  %v169_v53 = vld [vmem:[%s617_s3 + $0x10] sm:$0xff]  ;;  %v170_v54 = vld [vmem:[%s617_s3 + $0x18] sm:$0xff]  ;;  %s407_s3 = smov [#allocation3]  }
  0x12   :  { %55 = vperm.xlu1 %362, %v49_v16   ;;  %177 = vperm.xlu2 %363, %v171_v39   ;;  %s292_s5 = sshll.u32 %s407_s3, 4  ;;  %s293_s5 = int_to_ptr.vmem [resolvable:$true] %s292_s5 }
  0x14   :  { %336 = vmatpush.xpose.msk.msra.mxu3 %vm73_vm0, %v40_v5  ;;  %335 = vmatpush.xpose.msk.msra.mxu2 %vm73_vm0, %v40_v5 }
  0x15   :  { %307 = vmatpush.xpose.msk.msra.mxu0 %vm73_vm0, %v40_v5 }
  0x18   :  { %338 = vmatpush.xpose.msk.msra.mxu3 %vm73_vm0, %v39_v7  ;;  %337 = vmatpush.xpose.msk.msra.mxu2 %vm73_vm0, %v39_v7 }
  0x19   :  { %308 = vmatpush.xpose.msk.msra.mxu0 %vm73_vm0, %v39_v7  ;;  %187 = vperm.xlu0 %361, %v173_v14  }
  0x1a   :  { %192 = vperm.xlu1 %362, %v174_v20   ;;  %182 = vperm.xlu2 %363, %v172_v45  }
  0x1c   :  { %340 = vmatpush.xpose.msk.msra.mxu3 %vm73_vm0, %v38_v9  ;;  %339 = vmatpush.xpose.msk.msra.mxu2 %vm73_vm0, %v38_v9 }
  0x1d   :  { %309 = vmatpush.xpose.msk.msra.mxu0 %vm73_vm0, %v38_v9 }
  0x20   :  { %342 = vmatpush.xpose.msk.msra.mxu3 %vm73_vm0, %v37_v11  ;;  %341 = vmatpush.xpose.msk.msra.mxu2 %vm73_vm0, %v37_v11 }
  0x21   :  { %310 = vmatpush.xpose.msk.msra.mxu0 %vm73_vm0, %v37_v11  ;;  %253 = vperm.xlu0 %361, %v242_v18  }
  0x22   :  { %258 = vperm.xlu1 %362, %v243_v24   ;;  %248 = vperm.xlu2 %363, %v241_v50  }
  0x24   :  { %344 = vmatpush.xpose.msk.msra.mxu3 %vm73_vm0, %v36_v13  ;;  %343 = vmatpush.xpose.msk.msra.mxu2 %vm73_vm0, %v36_v13 }
  0x25   :  { %311 = vmatpush.xpose.msk.msra.mxu0 %vm73_vm0, %v36_v13 }
  0x28   :  { %346 = vmatpush.xpose.msk.msra.mxu3 %vm73_vm0, %v35_v15  ;;  %345 = vmatpush.xpose.msk.msra.mxu2 %vm73_vm0, %v35_v15 }
  0x29   :  { %312 = vmatpush.xpose.msk.msra.mxu0 %vm73_vm0, %v35_v15  ;;  %281 = vperm.xlu0 %361, %v245_v22  }
  0x2a   :  { %263 = vperm.xlu2 %363, %v244_v52  }
  0x2c   :  { %348 = vmatpush.xpose.msk.msra.mxu3 %vm73_vm0, %v34_v17  ;;  %347 = vmatpush.xpose.msk.msra.mxu2 %vm73_vm0, %v34_v17 }
  0x2d   :  { %313 = vmatpush.xpose.msk.msra.mxu0 %vm73_vm0, %v34_v17 }
  0x30   :  { %350 = vmatpush.xpose.msk.msra.mxu3 %vm73_vm0, %v33_v19  ;;  %349 = vmatpush.xpose.msk.msra.mxu2 %vm73_vm0, %v33_v19 }
  0x31   :  { %314 = vmatpush.xpose.msk.msra.mxu0 %vm73_vm0, %v33_v19 }
  0x34   :  { %352 = vmatpush.xpose.msk.msra.mxu3 %vm73_vm0, %v32_v21  ;;  %351 = vmatpush.xpose.msk.msra.mxu2 %vm73_vm0, %v32_v21 }
  0x35   :  { %315 = vmatpush.xpose.msk.msra.mxu0 %vm73_vm0, %v32_v21 }
  0x38   :  { %354 = vmatpush.xpose.msk.msra.mxu3 %vm73_vm0, %v31_v23  ;;  %353 = vmatpush.xpose.msk.msra.mxu2 %vm73_vm0, %v31_v23 }
  0x39   :  { %316 = vmatpush.xpose.msk.msra.mxu0 %vm73_vm0, %v31_v23 }
  0x3c   :  { %356 = vmatpush.xpose.msk.msra.mxu3 %vm73_vm0, %v30_v25  ;;  %355 = vmatpush.xpose.msk.msra.mxu2 %vm73_vm0, %v30_v25 }
  0x3d   :  { %317 = vmatpush.xpose.msk.msra.mxu0 %vm73_vm0, %v30_v25 }
  0x40   :  { %358 = vmatpush.xpose.msk.msra.mxu3 %vm73_vm0, %v29_v26  ;;  %357 = vmatpush.xpose.msk.msra.mxu2 %vm73_vm0, %v29_v26 }
  0x41   :  { %318 = vmatpush.xpose.msk.msra.mxu0 %vm73_vm0, %v29_v26 }
  0x43   :  { %321 = vmatmul.msk.f32.vlgmr.msra.gmra.mxu3 %vm73_vm0, %v47_v27  ;;  %320 = vmatmul.msk.f32.vlgmr.msra.gmra.mxu2 %vm73_vm0, %v46_v28 }
  0x44   :  { %319 = vmatmul.msk.f32.vlgmr.msra.gmra.mxu0 %vm73_vm0, %v45_v29 }
  0x4b   :  { %322 = vmatmul.msk.f32.gmra.mxu3 %vm73_vm0, %v48_v30 }
  0x6c   :  { %v178_v56 = vpop.permute.xlu2 %177 }
  0x74   :  { %v183_v58 = vpop.permute.xlu2 %182 }
  0x7b   :  { %v71_v31 = vpop.permute.xlu0 %70 }
  0x7c   :  { %v61_v33 = vpop.permute.xlu1 %60  ;;  %v249_v1 = vpop.permute.xlu2 %248 }
  0x83   :  { %v66_v34 = vpop.permute.xlu0 %65 }
  0x84   :  { %v56_v42 = vpop.permute.xlu1 %55  ;;  %v264_v14 = vpop.permute.xlu2 %263 }
  0x8b   :  { %v188_v60 = vpop.permute.xlu0 %187 }
  0x8c   :  { %v193_v0 = vpop.permute.xlu1 %192 }
  0x93   :  { %v254_v7 = vpop.permute.xlu0 %253 }
  0x94   :  { %v259_v9 = vpop.permute.xlu1 %258 }
  0x9b   :  { %v282_v22 = vpop.permute.xlu0 %281 }
  0x9c   :  { %v284_v24 = vperm.slane %v282_v22, 0 }
  0xc1   :  { %v151_v40 = vpop.f32.mrf.mxu0 }
  0xc2   :  { %v152_v43 = vadd.f32 %v151_v40, %v56_v42 }
  0xc6   :  { %v157_v32 = vpop.f32.mrf.mxu3  ;;  %v154_v35 = vpop.f32.mrf.mxu2 }
  0xc7   :  { %v158_v37 = vadd.f32 %v157_v32, %v66_v34  ;;  %v155_v41 = vadd.f32 %v154_v35, %v61_v33 }
  0xce   :  { %v160_v36 = vpop.f32.mrf.mxu3 }
  0xcf   :  { %v161_v38 = vadd.f32 %v160_v36, %v71_v31 }
  0xd1   :  { %364 = vtanh.f32 %v161_v38 }
  0xd2   :  { %366 = vtanh.f32 %v158_v37 }
  0xd3   :  { %368 = vtanh.f32 %v155_v41 }
  0xd4   :  { %370 = vtanh.f32 %v152_v43 }
  0xd7   :  { %v365_v44 = vpop.eup %364 }
  0xd8   :  { %220 = vmatpush.msra.mxu1 %v365_v44  ;;  %v367_v46 = vpop.eup %366 }
  0xd9   :  { %v369_v47 = vpop.eup %368 }
  0xda   :  { %221 = vmatpush.msra.mxu1 %v367_v46  ;;  %v371_v49 = vpop.eup %370 }
  0xdc   :  { %222 = vmatpush.msra.mxu1 %v369_v47 }
  0xde   :  { %223 = vmatpush.msra.mxu1 %v371_v49 }
  0xdf   :  { %323 = vmatmul.msk.f32.vlgmr.msra.gmra.mxu1 %vm195_vm1, %v167_v48 }
  0xe7   :  { %324 = vmatmul.msk.f32.gmra.mxu1 %vm195_vm1, %v168_v51 }
  0xef   :  { %325 = vmatmul.msk.f32.gmra.mxu1 %vm195_vm1, %v169_v53 }
  0xf7   :  { %326 = vmatmul.msk.f32.gmra.mxu1 %vm195_vm1, %v170_v54 }
 0x15c   :  { %v225_v55 = vpop.f32.mrf.mxu1 }
 0x15d   :  { %v226_v61 = vadd.f32 %v225_v55, %v178_v56 }
 0x164   :  { %v228_v57 = vpop.f32.mrf.mxu1 }
 0x165   :  { %v229_v59 = vadd.f32 %v228_v57, %v183_v58 }
 0x167   :  { %372 = vtanh.f32 %v229_v59 }
 0x168   :  { %374 = vtanh.f32 %v226_v61 }
 0x16c   :  { %v231_v62 = vpop.f32.mrf.mxu1 }
 0x16d   :  { %v232_v63 = vadd.f32 %v231_v62, %v188_v60  ;;  %v373_v3 = vpop.eup %372 }
 0x16e   :  { %v375_v5 = vpop.eup %374  ;;  %v267_v8 = vmul.f32 %v373_v3, %v254_v7 }
 0x16f   :  { %376 = vtanh.f32 %v232_v63  ;;  %v266_v10 = vmul.f32 %v375_v5, %v249_v1 }
 0x171   :  { %v270_v12 = vadd.f32 %v267_v8, %v266_v10 }
 0x174   :  { %v234_v2 = vpop.f32.mrf.mxu1 }
 0x175   :  { %v235_v4 = vadd.f32 %v234_v2, %v193_v0  ;;  %v377_v6 = vpop.eup %376 }
 0x176   :  { %v268_v11 = vmul.f32 %v377_v6, %v259_v9 }
 0x177   :  { %378 = vtanh.f32 %v235_v4 }
 0x178   :  { %v271_v15 = vadd.f32 %v270_v12, %v268_v11 }
 0x17d   :  { %v379_v13 = vpop.eup %378 }
 0x17e   :  { %v269_v16 = vmul.f32 %v379_v13, %v264_v14 }
 0x180   :  { %v272_v17 = vadd.f32 %v271_v15, %v269_v16 }
 0x182   :  { %v273_v18 = vrot.slane %v272_v17, 4 }
 0x184   :  { %v274_v19 = vadd.f32 %v273_v18, %v272_v17 }
 0x186   :  { %v275_v20 = vrot.slane %v274_v19, 2 }
 0x188   :  { %v276_v21 = vadd.f32 %v275_v20, %v274_v19 }
 0x18a   :  { %v277_v23 = vrot.slane %v276_v21, 1 }
 0x18c   :  { %v278_v25 = vadd.f32 %v277_v23, %v276_v21 }
 0x18e   :  { %v285_v26 = vadd.f32 %v284_v24, %v278_v25 }
 0x190   :  { %286 = vst [vmem:[#allocation3] sm:$0x1] %v285_v26 }
 0x191   :  { %297 = dma.vmem_to_hbm [thread:$0]  %s293_s5, 16, %s295_s23, [#allocation4]  }
 0x192   :  { %404 = dma.done.wait [#allocation4], 16  }
 0x193   :  { %405 = vsyncadd [#allocation4], 4294967280 }
 0x194   :  { %302 = vsyncpa [#allocation4], 1 }

</bundles_post_ra>
